<compile_context>
chip_gen: v7x
topology: tpu7x:2x2x1
jax: 0.10.0
libtpu: 0.0.40
codegen_flags: <defaults>
</compile_context>

<pallas_src>
import functools

import numpy as np

import jax
import jax.numpy as jnp
from jax import lax
from jax.experimental import pallas as pl
from jax.experimental.pallas import tpu as pltpu

_EPS = 1e-5
_LEAKY_SLOPE = 0.2
_LANE = 128
_TILE_TARGET_ROWS = 1024


def _round_up(x, m):
    return (x + m - 1) // m * m


def _tpu_vmem_bytes():
    """Per-core VMEM capacity; conservative 64 MiB fallback (v7x)."""
    try:
        info = pltpu.get_tpu_info()
        for attr in ("vmem_capacity_bytes", "vmem_bytes", "vmem_size_bytes"):
            v = getattr(info, attr, None)
            if v:
                return int(v)
    except Exception:
        pass
    return 64 << 20


# ----------------------------------------------------------------------------
# Bilinear interpolation as a dense matrix.  Matches F.interpolate(
# mode='bilinear', align_corners=False): half-pixel centers, edge clamping.
# ----------------------------------------------------------------------------
def _interp_matrix(out_size, in_size):
    if out_size == in_size:
        return np.eye(in_size, dtype=np.float32)
    scale = in_size / out_size
    coords = np.clip((np.arange(out_size, dtype=np.float64) + 0.5) * scale - 0.5,
                     0.0, in_size - 1)
    lo = np.floor(coords).astype(np.int64)
    hi = np.minimum(lo + 1, in_size - 1)
    frac = (coords - lo).astype(np.float32)
    m = np.zeros((out_size, in_size), dtype=np.float32)
    rows = np.arange(out_size)
    m[rows, lo] += (1.0 - frac)
    m[rows, hi] += frac          # lo == hi (clamped) rows accumulate to 1.0
    return m


def _choose_tile_hw(hw, row_bytes, vmem_cap):
    """Largest divisor of hw (multiple of 8 unless == hw) within the row
    target and a generation-aware per-step VMEM budget."""
    budget = max(vmem_cap // 4, 8 << 20)
    cap = min(_TILE_TARGET_ROWS, max(8, budget // max(row_bytes, 1)))
    if hw <= cap:
        return hw
    for t in range(int(cap), 7, -1):
        if hw % t == 0 and t % 8 == 0:
            return t
    return hw    # rare fallback (odd/prime HW): whole extent


def _vmem_params(need_bytes, vmem_cap):
    limit = int(need_bytes) + (8 << 20)      # headroom for compiler scratch
    limit = max(limit, 24 << 20)
    limit = min(limit, (vmem_cap * 3) // 4)  # never claim near-physical VMEM
    return {"vmem_limit_bytes": int(limit)}


def _plan_fused(hw, cp, cin_sum, tile, vmem_cap):
    need = (2 * hw * cp * 4                    # resident output slab (x2 bufs)
            + 2 * tile * 2 * cin_sum           # double-buffered bf16 inputs
            + 2 * (2 * cin_sum * cp + 4 * cp)  # weights + bias
            + 4 * cp)                          # stats scratch
    return need <= (vmem_cap * 5) // 8, need


# ----------------------------------------------------------------------------
# FUSED single-pass kernel: 1x1 conv (MXU, f32 accum) into a VMEM-resident
# per-sample slab + streaming channel sums; on the last HW tile, exact
# centered InstanceNorm + LeakyReLU in place.  No f32 intermediate in HBM.
# ----------------------------------------------------------------------------
def _fused_kernel(num_features, inv_hw, *refs):
    x_refs = refs[:num_features]
    w_refs = refs[num_features:2 * num_features]
    b_ref = refs[2 * num_features]
    o_ref = refs[2 * num_features + 1]
    s1_ref = refs[2 * num_features + 2]

    j = pl.program_id(1)
    nj = pl.num_programs(1)
    tile = x_refs[0].shape[1]

    @pl.when(j == 0)
    def _():
        s1_ref[...] = jnp.zeros_like(s1_ref)

    # K-split / concatenated 1x1 conv (the channel concat never hits HBM).
    acc = jnp.dot(x_refs[0][0], w_refs[0][...],
                  preferred_element_type=jnp.float32)
    for i in range(1, num_features):
        acc = acc + jnp.dot(x_refs[i][0], w_refs[i][...],
                            preferred_element_type=jnp.float32)
    y = acc + b_ref[...]                               # (tile, Cp) f32

    off = pl.multiple_of(j * tile, tile)
    o_ref[0, pl.ds(off, tile), :] = y                  # resident VMEM slab
    s1_ref[...] += jnp.sum(y, axis=0, keepdims=True)

    @pl.when(j == nj - 1)
    def _():
        full = o_ref[0]                                # (HW, Cp) f32, in VMEM
        mean = s1_ref[...] * inv_hw                    # (1, Cp)
        centered = full - mean
        # Exact biased (centered) variance — matches torch InstanceNorm2d and
        # avoids E[y^2] - mean^2 cancellation.
        var = jnp.sum(centered * centered, axis=0, keepdims=True) * inv_hw
        scale = lax.rsqrt(var + _EPS)
        yhat = centered * scale
        o_ref[0] = jnp.where(yhat >= 0.0, yhat, _LEAKY_SLOPE * yhat)


def _fused_call(xs, ws, bias, n, hw, cp, tile, need, vmem_cap):
    num_features = len(xs)
    cin_list = [int(x.shape[2]) for x in xs]
    grid = (n, hw // tile)

    in_specs = ([pl.BlockSpec((1, tile, c), lambda i, j: (i, j, 0))
                 for c in cin_list]
                + [pl.BlockSpec((c, cp), lambda i, j: (0, 0))
                   for c in cin_list]
                + [pl.BlockSpec((1, cp), lambda i, j: (0, 0))])
    out_specs = pl.BlockSpec((1, hw, cp), lambda i, j: (i, 0, 0))

    cin_sum = sum(cin_list)
    cost = pl.CostEstimate(
        flops=2 * n * hw * cin_sum * cp + 8 * n * hw * cp,
        transcendentals=n * cp,
        bytes_accessed=(2 * n * hw * cin_sum
                        + 2 * cin_sum * cp + 4 * cp
                        + 4 * n * hw * cp))
    return pl.pallas_call(
        functools.partial(_fused_kernel, num_features, 1.0 / hw),
        out_shape=jax.ShapeDtypeStruct((n, hw, cp), jnp.float32),
        grid_spec=pltpu.PrefetchScalarGridSpec(
            num_scalar_prefetch=0,
            grid=grid,
            in_specs=in_specs,
            out_specs=out_specs,
            scratch_shapes=[pltpu.VMEM((1, cp), jnp.float32)]),
        compiler_params=pltpu.CompilerParams(
            dimension_semantics=("parallel", "arbitrary"),
            **_vmem_params(need, vmem_cap)),
        cost_estimate=cost,
    )(*xs, *ws, bias)


# ----------------------------------------------------------------------------
# TWO-PASS fallback (per-sample slab too large for VMEM).
# Pass 1: conv + stats; bf16 intermediate; finalize mean / inv_std.
# ----------------------------------------------------------------------------
def _conv_stats_kernel(num_features, inv_hw, *refs):
    x_refs = refs[:num_features]
    w_refs = refs[num_features:2 * num_features]
    b_ref = refs[2 * num_features]
    y_ref, m_ref, r_ref = refs[2 * num_features + 1:2 * num_features + 4]
    s1_ref, s2_ref = refs[2 * num_features + 4:]

    j = pl.program_id(1)

    @pl.when(j == 0)
    def _():
        s1_ref[...] = jnp.zeros_like(s1_ref)
        s2_ref[...] = jnp.zeros_like(s2_ref)

    acc = jnp.dot(x_refs[0][0], w_refs[0][...],
                  preferred_element_type=jnp.float32)
    for i in range(1, num_features):
        acc = acc + jnp.dot(x_refs[i][0], w_refs[i][...],
                            preferred_element_type=jnp.float32)
    y = acc + b_ref[...]                                  # (tile, Cp) f32
    y_ref[0] = y.astype(y_ref.dtype)                      # bf16 intermediate
    s1_ref[...] += jnp.sum(y, axis=0, keepdims=True)      # stats from f32 acc
    s2_ref[...] += jnp.sum(y * y, axis=0, keepdims=True)

    @pl.when(j == pl.num_programs(1) - 1)
    def _():
        mean = s1_ref[...] * inv_hw
        # E[y^2]-mean^2 can cancel for very large means; fused path (preferred)
        # uses exact centered variance instead.
        var = jnp.maximum(s2_ref[...] * inv_hw - mean * mean, 0.0)
        m_ref[0] = mean
        r_ref[0] = lax.rsqrt(var + _EPS)


def _conv_stats_call(xs, ws, bias, n, hw, cp, vmem_cap):
    num_features = len(xs)
    cin_list = [int(x.shape[2]) for x in xs]
    cin_sum = sum(cin_list)
    # double-buffered bf16 inputs + double-buffered bf16 conv-output tile
    row_bytes = 2 * 2 * cin_sum + 2 * 2 * cp
    tile = _choose_tile_hw(hw, row_bytes, vmem_cap)
    grid = (n, hw // tile)

    in_specs = ([pl.BlockSpec((1, tile, c), lambda i, j: (i, j, 0))
                 for c in cin_list]
                + [pl.BlockSpec((c, cp), lambda i, j: (0, 0))
                   for c in cin_list]
                + [pl.BlockSpec((1, cp), lambda i, j: (0, 0))])
    out_specs = [
        pl.BlockSpec((1, tile, cp), lambda i, j: (i, j, 0)),   # y (bf16)
        pl.BlockSpec((1, 1, cp), lambda i, j: (i, 0, 0)),      # mean
        pl.BlockSpec((1, 1, cp), lambda i, j: (i, 0, 0)),      # inv_std
    ]
    out_shape = (
        jax.ShapeDtypeStruct((n, hw, cp), jnp.bfloat16),
        jax.ShapeDtypeStruct((n, 1, cp), jnp.float32),
        jax.ShapeDtypeStruct((n, 1, cp), jnp.float32),
    )
    need = tile * row_bytes + 2 * (2 * cin_sum * cp + 4 * cp) + 8 * cp
    cost = pl.CostEstimate(
        flops=2 * n * hw * cin_sum * cp + 4 * n * hw * cp,
        transcendentals=n * cp,
        bytes_accessed=(2 * n * hw * cin_sum + 2 * cin_sum * cp + 4 * cp
                        + 2 * n * hw * cp + 8 * n * cp))
    return pl.pallas_call(
        functools.partial(_conv_stats_kernel, num_features, 1.0 / hw),
        out_shape=out_shape,
        grid_spec=pltpu.PrefetchScalarGridSpec(
            num_scalar_prefetch=0,
            grid=grid,
            in_specs=in_specs,
            out_specs=out_specs,
            scratch_shapes=[pltpu.VMEM((1, cp), jnp.float32),
                            pltpu.VMEM((1, cp), jnp.float32)]),
        compiler_params=pltpu.CompilerParams(
            dimension_semantics=("parallel", "arbitrary"),
            **_vmem_params(need, vmem_cap)),
        cost_estimate=cost,
    )(*xs, *ws, bias)


# Pass 2: pure multiply-add + LeakyReLU, streamed over bf16 intermediate.
def _norm_kernel(y_ref, m_ref, r_ref, o_ref):
    yhat = (y_ref[0].astype(jnp.float32) - m_ref[0]) * r_ref[0]
    o_ref[0] = jnp.where(yhat >= 0.0, yhat,
                         _LEAKY_SLOPE * yhat).astype(o_ref.dtype)


def _norm_call(y, m, r, n, hw, cp, vmem_cap):
    row_bytes = 2 * 2 * cp + 2 * 4 * cp       # bf16 in + f32 out, double-buf
    tile = _choose_tile_hw(hw, row_bytes, vmem_cap)
    grid = (n, hw // tile)
    in_specs = [
        pl.BlockSpec((1, tile, cp), lambda i, j: (i, j, 0)),
        pl.BlockSpec((1, 1, cp), lambda i, j: (i, 0, 0)),
        pl.BlockSpec((1, 1, cp), lambda i, j: (i, 0, 0)),
    ]
    out_specs = pl.BlockSpec((1, tile, cp), lambda i, j: (i, j, 0))
    need = tile * row_bytes + 16 * cp
    cost = pl.CostEstimate(
        flops=4 * n * hw * cp, transcendentals=0,
        bytes_accessed=6 * n * hw * cp + 8 * n * cp)
    return pl.pallas_call(
        _norm_kernel,
        out_shape=jax.ShapeDtypeStruct((n, hw, cp), jnp.float32),
        grid_spec=pltpu.PrefetchScalarGridSpec(
            num_scalar_prefetch=0,
            grid=grid,
            in_specs=in_specs,
            out_specs=out_specs),
        compiler_params=pltpu.CompilerParams(
            dimension_semantics=("parallel", "parallel"),
            **_vmem_params(need, vmem_cap)),
        cost_estimate=cost,
    )(y, m, r)


# ----------------------------------------------------------------------------
# Full ASFF forward (inputs/outputs in PyTorch NCHW convention).
# ----------------------------------------------------------------------------
def asff_forward(features, level, w_conv, b_conv, force_two_pass=False):
    """features: list of (N, Ci, Hi, Wi) f32; w_conv: (Cout, sum(Ci), 1, 1)."""
    target_h, target_w = (int(d) for d in features[level].shape[2:])
    n = int(features[level].shape[0])
    hw = target_h * target_w
    cout = int(w_conv.shape[0])
    cp = _round_up(cout, _LANE)
    cin_list = [int(f.shape[1]) for f in features]

    # Bilinear resize as bf16 matmuls emitting NHWC directly (no f32
    # intermediate + transpose in the wrapper).
    xs_all = []
    for f in features:
        fn, c, h, w = (int(d) for d in f.shape)
        fb = f.astype(jnp.bfloat16)
        if (h, w) != (target_h, target_w):
            ry = jnp.asarray(_interp_matrix(target_h, h), dtype=jnp.bfloat16)
            rx = jnp.asarray(_interp_matrix(target_w, w), dtype=jnp.bfloat16)
            t = jnp.einsum('nchw,oh,pw->nopc', fb, ry, rx)
        else:
            t = jnp.transpose(fb, (0, 2, 3, 1))
        xs_all.append(t.reshape(fn, hw, c))

    # Small channel counts: concat in the wrapper -> one dense-K matmul with
    # lane-dense loads.  K-split only when every Ci is already lane-aligned.
    w2 = w_conv[:, :, 0, 0]                                   # (Cout, Cin_total)
    k_split = len(features) > 1 and all(c % _LANE == 0 for c in cin_list)
    if k_split:
        xs = xs_all
        ws, off = [], 0
        for c in cin_list:
            wi = jnp.transpose(w2[:, off:off + c], (1, 0))    # (Ci, Cout)
            ws.append(jnp.pad(wi, ((0, 0), (0, cp - cout))).astype(jnp.bfloat16))
            off += c
    else:
        xs = [jnp.concatenate(xs_all, axis=2)]
        wi = jnp.transpose(w2, (1, 0))                        # (Cin_total, Cout)
        ws = [jnp.pad(wi, ((0, 0), (0, cp - cout))).astype(jnp.bfloat16)]
    # Padded output channels MUST have zero weight AND zero bias so their
    # InstanceNorm output is exactly 0 (var=0 -> yhat=0) before slicing off.
    bias = jnp.pad(b_conv, (0, cp - cout)).reshape(1, cp).astype(jnp.float32)

    vmem_cap = _tpu_vmem_bytes()
    cin_sum = sum(int(x.shape[2]) for x in xs)
    row_in = 2 * 2 * cin_sum
    tile = _choose_tile_hw(hw, row_in, vmem_cap)
    fused_ok, need = _plan_fused(hw, cp, cin_sum, tile, vmem_cap)

    if fused_ok and not force_two_pass:
        out = _fused_call(xs, ws, bias, n, hw, cp, tile, need, vmem_cap)
    else:
        y, m, r = _conv_stats_call(xs, ws, bias, n, hw, cp, vmem_cap)
        out = _norm_call(y, m, r, n, hw, cp, vmem_cap)

    out = out[:, :, :cout]                                     # drop padded lanes
    return jnp.transpose(out.reshape(n, target_h, target_w, cout), (0, 3, 1, 2))


# ----------------------------------------------------------------------------
# Pure-JAX f32 reference (loose correctness check against bf16 kernel path).
# ----------------------------------------------------------------------------
def asff_reference(features, level, w_conv, b_conv):
    target_h, target_w = (int(d) for d in features[level].shape[2:])
    resized = []
    for f in features:
        _, _, h, w = (int(d) for d in f.shape)
        if (h, w) != (target_h, target_w):
            ry = jnp.asarray(_interp_matrix(target_h, h))
            rx = jnp.asarray(_interp_matrix(target_w, w))
            f = jnp.einsum('nchw,oh,pw->ncop', f, ry, rx)
        resized.append(f)
    x = jnp.concatenate(resized, axis=1)
    y = jnp.einsum('nchw,oc->nohw', x, w_conv[:, :, 0, 0]) \
        + b_conv[None, :, None, None]
    mean = jnp.mean(y, axis=(2, 3), keepdims=True)
    var = jnp.mean((y - mean) ** 2, axis=(2, 3), keepdims=True)
    yhat = (y - mean) * lax.rsqrt(var + _EPS)
    return jnp.where(yhat >= 0, yhat, _LEAKY_SLOPE * yhat)


if __name__ == "__main__":
    key = jax.random.PRNGKey(0)
    k0, k1, k2, kw, kb = jax.random.split(key, 5)

    # Three pyramid levels; level=1 is the fusion target (8x8 spatial).
    feature_channels = (4, 8, 16)
    level = 1
    f0 = jax.random.normal(k0, (2, 4, 16, 16), dtype=jnp.float32)
    f1 = jax.random.normal(k1, (2, 8, 8, 8), dtype=jnp.float32)
    f2 = jax.random.normal(k2, (2, 16, 4, 4), dtype=jnp.float32)

    cin_total = sum(feature_channels)          # 28
    cout = feature_channels[level]             # 8
    w_conv = 0.05 * jax.random.normal(kw, (cout, cin_total, 1, 1),
                                      dtype=jnp.float32)
    b_conv = 0.05 * jax.random.normal(kb, (cout,), dtype=jnp.float32)

    fwd_fused = jax.jit(
        lambda fs, w, b: asff_forward(fs, level, w, b, force_two_pass=False))
    fwd_two = jax.jit(
        lambda fs, w, b: asff_forward(fs, level, w, b, force_two_pass=True))

    out = fwd_fused([f0, f1, f2], w_conv, b_conv)
    jax.block_until_ready(out)
    assert out.shape == (2, cout, 8, 8), out.shape

    out2 = fwd_two([f0, f1, f2], w_conv, b_conv)
    jax.block_until_ready(out2)
    assert out2.shape == (2, cout, 8, 8), out2.shape

    ref = asff_reference([f0, f1, f2], level, w_conv, b_conv)
    err_fused = float(jnp.max(jnp.abs(out - ref)))
    err_two = float(jnp.max(jnp.abs(out2 - ref)))
    # Loose tolerance: activations/weights run through the MXU in bf16.
    assert err_fused < 0.15, f"fused path max abs err vs f32 ref: {err_fused}"
    assert err_two < 0.15, f"two-pass path max abs err vs f32 ref: {err_two}"
    print("KERNEL_OK")
</pallas_src>

<mosaic_0001>
module attributes {stable_mosaic.version = 11 : i64} {
  func.func @_fused_kernel(%arg0: i32, %arg1: i32, %arg2: memref<1x64x28xbf16, #tpu.memory_space<vmem>>, %arg3: memref<28x128xbf16, #tpu.memory_space<vmem>>, %arg4: memref<1x128xf32, #tpu.memory_space<vmem>>, %arg5: memref<1x64x128xf32, #tpu.memory_space<vmem>>, %arg6: memref<1x128xf32, #tpu.memory_space<vmem>>) attributes {dimension_semantics = [#tpu.dimension_semantics<parallel>, #tpu.dimension_semantics<arbitrary>], iteration_bounds = array<i64: 2, 1>, scalar_prefetch = 0 : i64, scratch_operands = 1 : i64, tpu.core_type = #tpu.core_type<tc>, window_params = [{transform_indices = @transform_0, window_bounds = array<i64: 1, 64, 28>}, {pipeline_mode = #tpu.pipeline_mode<synchronous>, transform_indices = @transform_1, window_bounds = array<i64: 28, 128>}, {pipeline_mode = #tpu.pipeline_mode<synchronous>, transform_indices = @transform_2, window_bounds = array<i64: 1, 128>}, {transform_indices = @transform_3, window_bounds = array<i64: 1, 64, 128>}]} {
    %c0_i32 = arith.constant 0 : i32
    %0 = arith.cmpi eq, %arg1, %c0_i32 : i32
    %1 = arith.extui %0 : i1 to i32
    %c0_i32_0 = arith.constant 0 : i32
    %2 = arith.cmpi ne, %1, %c0_i32_0 : i32
    scf.if %2 {
      %cst_16 = arith.constant 0.000000e+00 : f32
      %24 = vector.broadcast %cst_16 : f32 to vector<1x128xf32>
      %c0_17 = arith.constant 0 : index
      %c0_18 = arith.constant 0 : index
      %25 = vector.load %arg6[%c0_17, %c0_18] : memref<1x128xf32, #tpu.memory_space<vmem>>, vector<1x128xf32>
      tpu.vector_store %arg6[%c0_17, %c0_18], %24 {strides = array<i32>} : memref<1x128xf32, #tpu.memory_space<vmem>>, vector<1x128xf32>,
    } else {
    }
    %c0 = arith.constant 0 : index
    %c0_1 = arith.constant 0 : index
    %c0_2 = arith.constant 0 : index
    %3 = vector.load %arg2[%c0, %c0_1, %c0_2] : memref<1x64x28xbf16, #tpu.memory_space<vmem>>, vector<1x64x28xbf16>
    %4 = vector.shape_cast %3 : vector<1x64x28xbf16> to vector<64x28xbf16>
    %c0_3 = arith.constant 0 : index
    %c0_4 = arith.constant 0 : index
    %5 = vector.load %arg3[%c0_3, %c0_4] : memref<28x128xbf16, #tpu.memory_space<vmem>>, vector<28x128xbf16>
    %cst = arith.constant dense<0.000000e+00> : vector<64x128xf32>
    %6 = tpu.matmul %4, %5, %cst {dimension_numbers = #tpu.dot_dimension_numbers<[1], [0], [0], [1], [0, 0, 1, 1], [], []>} : vector<64x28xbf16>, vector<28x128xbf16>, vector<64x128xf32> -> vector<64x128xf32>
    %c0_5 = arith.constant 0 : index
    %c0_6 = arith.constant 0 : index
    %7 = vector.load %arg4[%c0_5, %c0_6] : memref<1x128xf32, #tpu.memory_space<vmem>>, vector<1x128xf32>
    %8 = vector.broadcast %7 : vector<1x128xf32> to vector<64x128xf32>
    %9 = arith.addf %6, %8 : vector<64x128xf32>
    %c64_i32 = arith.constant 64 : i32
    %10 = arith.muli %arg1, %c64_i32 : i32
    %11 = tpu.assume_multiple %10, 64 : i32
    %c0_7 = arith.constant 0 : index
    %12 = arith.index_cast %11 : i32 to index
    %c0_8 = arith.constant 0 : index
    %13 = vector.load %arg5[%c0_7, %12, %c0_8] : memref<1x64x128xf32, #tpu.memory_space<vmem>>, vector<1x64x128xf32>
    %14 = vector.shape_cast %13 : vector<1x64x128xf32> to vector<64x128xf32>
    %15 = vector.shape_cast %9 : vector<64x128xf32> to vector<1x64x128xf32>
    tpu.vector_store %arg5[%c0_7, %12, %c0_8], %15 {strides = array<i32>} : memref<1x64x128xf32, #tpu.memory_space<vmem>>, vector<1x64x128xf32>,
    %c0_9 = arith.constant 0 : index
    %c0_10 = arith.constant 0 : index
    %16 = vector.load %arg6[%c0_9, %c0_10] : memref<1x128xf32, #tpu.memory_space<vmem>>, vector<1x128xf32>
    %cst_11 = arith.constant dense<0.000000e+00> : vector<128xf32>
    %17 = vector.multi_reduction <add>, %9, %cst_11 [0] : vector<64x128xf32> to vector<128xf32>
    %18 = vector.shape_cast %17 : vector<128xf32> to vector<1x128xf32>
    %19 = arith.addf %16, %18 : vector<1x128xf32>
    %c0_12 = arith.constant 0 : index
    %c0_13 = arith.constant 0 : index
    %20 = vector.load %arg6[%c0_12, %c0_13] : memref<1x128xf32, #tpu.memory_space<vmem>>, vector<1x128xf32>
    tpu.vector_store %arg6[%c0_12, %c0_13], %19 {strides = array<i32>} : memref<1x128xf32, #tpu.memory_space<vmem>>, vector<1x128xf32>,
    %c0_i32_14 = arith.constant 0 : i32
    %21 = arith.cmpi eq, %arg1, %c0_i32_14 : i32
    %22 = arith.extui %21 : i1 to i32
    %c0_i32_15 = arith.constant 0 : i32
    %23 = arith.cmpi ne, %22, %c0_i32_15 : i32
    scf.if %23 {
      %c0_16 = arith.constant 0 : index
      %c0_17 = arith.constant 0 : index
      %c0_18 = arith.constant 0 : index
      %24 = vector.load %arg5[%c0_16, %c0_17, %c0_18] : memref<1x64x128xf32, #tpu.memory_space<vmem>>, vector<1x64x128xf32>
      %25 = vector.shape_cast %24 : vector<1x64x128xf32> to vector<64x128xf32>
      %c0_19 = arith.constant 0 : index
      %c0_20 = arith.constant 0 : index
      %26 = vector.load %arg6[%c0_19, %c0_20] : memref<1x128xf32, #tpu.memory_space<vmem>>, vector<1x128xf32>
      %cst_21 = arith.constant 1.562500e-02 : f32
      %27 = vector.broadcast %cst_21 : f32 to vector<1x128xf32>
      %28 = arith.mulf %26, %27 : vector<1x128xf32>
      %29 = vector.broadcast %28 : vector<1x128xf32> to vector<64x128xf32>
      %30 = arith.subf %25, %29 : vector<64x128xf32>
      %31 = arith.mulf %30, %30 : vector<64x128xf32>
      %cst_22 = arith.constant dense<0.000000e+00> : vector<128xf32>
      %32 = vector.multi_reduction <add>, %31, %cst_22 [0] : vector<64x128xf32> to vector<128xf32>
      %33 = vector.shape_cast %32 : vector<128xf32> to vector<1x128xf32>
      %cst_23 = arith.constant 1.562500e-02 : f32
      %34 = vector.broadcast %cst_23 : f32 to vector<1x128xf32>
      %35 = arith.mulf %33, %34 : vector<1x128xf32>
      %cst_24 = arith.constant 9.99999974E-6 : f32
      %36 = vector.broadcast %cst_24 : f32 to vector<1x128xf32>
      %37 = arith.addf %35, %36 : vector<1x128xf32>
      %38 = math.rsqrt %37 : vector<1x128xf32>
      %39 = vector.broadcast %38 : vector<1x128xf32> to vector<64x128xf32>
      %40 = arith.mulf %30, %39 : vector<64x128xf32>
      %cst_25 = arith.constant 0.000000e+00 : f32
      %41 = vector.broadcast %cst_25 : f32 to vector<64x128xf32>
      %42 = arith.cmpf oge, %40, %41 : vector<64x128xf32>
      %cst_26 = arith.constant 2.000000e-01 : f32
      %43 = vector.broadcast %cst_26 : f32 to vector<64x128xf32>
      %44 = arith.mulf %43, %40 : vector<64x128xf32>
      %45 = arith.select %42, %40, %44 : vector<64x128xi1>, vector<64x128xf32>
      %c0_27 = arith.constant 0 : index
      %c0_28 = arith.constant 0 : index
      %c0_29 = arith.constant 0 : index
      %46 = vector.load %arg5[%c0_27, %c0_28, %c0_29] : memref<1x64x128xf32, #tpu.memory_space<vmem>>, vector<1x64x128xf32>
      %47 = vector.shape_cast %46 : vector<1x64x128xf32> to vector<64x128xf32>
      %48 = vector.shape_cast %45 : vector<64x128xf32> to vector<1x64x128xf32>
      tpu.vector_store %arg5[%c0_27, %c0_28, %c0_29], %48 {strides = array<i32>} : memref<1x64x128xf32, #tpu.memory_space<vmem>>, vector<1x64x128xf32>,
    } else {
    }
    return
  }
  func.func @transform_0(%arg0: i32, %arg1: i32) -> (i32, i32, i32) {
    %c0_i32 = arith.constant 0 : i32
    %c0_i32_0 = arith.constant 0 : i32
    return %arg0, %arg1, %c0_i32 : i32, i32, i32
  }
  func.func @transform_1(%arg0: i32, %arg1: i32) -> (i32, i32) {
    %c0_i32 = arith.constant 0 : i32
    %c0_i32_0 = arith.constant 0 : i32
    %c0_i32_1 = arith.constant 0 : i32
    return %c0_i32, %c0_i32_0 : i32, i32
  }
  func.func @transform_2(%arg0: i32, %arg1: i32) -> (i32, i32) {
    %c0_i32 = arith.constant 0 : i32
    %c0_i32_0 = arith.constant 0 : i32
    %c0_i32_1 = arith.constant 0 : i32
    return %c0_i32, %c0_i32_0 : i32, i32
  }
  func.func @transform_3(%arg0: i32, %arg1: i32) -> (i32, i32, i32) {
    %c0_i32 = arith.constant 0 : i32
    %c0_i32_0 = arith.constant 0 : i32
    %c0_i32_1 = arith.constant 0 : i32
    return %arg0, %c0_i32, %c0_i32_0 : i32, i32, i32
  }
}

</mosaic_0001>

<bundles_post_ra>
// kernel: _lambda_.1
= control target key start
LH: loop header
LB: loop body
LE: loop exit
PB: predicated region body
PF: predicated region fallthrough
CT: control target
= control target key end

     0   :  { %s651_s12 = smov 0   ;;  %s653_s13 = smov 0   ;;  %s705_s0 = inlined_call_operand.vmem [shape: bf16[2,64,28], index: 0, kind: input, shape index: {}]   ;;  %s706_s1 = inlined_call_operand.vmem [shape: bf16[28,128], index: 1, kind: input, shape index: {}]   ;;  %s707_s2 = inlined_call_operand.vmem [shape: f32[1,128], index: 2, kind: input, shape index: {}]   ;;  %s708_s3 = inlined_call_operand.vmem [shape: f32[2,64,128], index: 3, kind: output, shape index: {}]  }
   0x1   :  { %s655_s14 = smov 0  }
   0x2 LB: > { %s25_s15 = sadd.s32 1, %s624_s13  ;;  %p529_p0 = scmp.ge.s32.totalorder %s628_s14, 1  ;;  %s628_s14 = sphi %s655_s14, %s13_s14   ;;  %s624_s13 = sphi %s653_s13, %s710_s13   ;;  %s620_s12 = sphi %s651_s12, %s709_s12  }
   0x3   : > { %p27_p1 = scmp.ge.s32.totalorder %s25_s15, 2  ;;  %p156_p2 = scmp.lt.s32.totalorder %s628_s14, 3 }
   0x5   : > { %s712_s15 = smov (%p27_p1, %s25_s15), 0  ;;  %p157_p3 = pnand %p529_p0, %p156_p2 }
   0x6   : > { %v598_v0 = vld [vmem:[%s706_s1] sm:$0xff] (!%p157_p3)   ;;  %vm268_vm0 = vcmask (!%p157_p3), 1045504   ;;  %v599_v1 = vld [vmem:[%s706_s1 + $0x8] sm:$0x3f] (!%p157_p3)   ;;  %p185_p4 = scmp.lt.s32.totalorder (!%p157_p3), %s620_s12, 1  ;;  %vm255_vm1 = vcmask (!%p157_p3), 228352   ;;  %v377_v40 = vlaneseq (!%p157_p3) }
   0x7   : > { %160 = sbr.rel (%p157_p3) target bundleno = 333 (0x14d), region = 32  ;;  %555 = vmatprep.subr.bf16.mxu0 (!%p157_p3), %v598_v0  ;;  %567 = vmatprep.subr.bf16.mxu1 (!%p157_p3), %v598_v0  ;;  %v270_v2 = vsel (!%p157_p3), %vm268_vm0, %v599_v1, 0  ;;  %v630_v7 = vmov (!%p157_p3), 0.0   ;;  %v534_v9 = vld [vmem:[%s707_s2] ss:$0 sm:$0xff] (!%p157_p3) }
   0x8   : > { %556 = vmatpush3.bf16.msra.mxu0 (!%p157_p3), %v598_v0  ;;  %569 = vmatpush3.bf16.msra.mxu1 (!%p157_p3), %v598_v0  ;;  %204 = vst [vmem:[#allocation2] sm:$0x1] (!%p157_p3), %v630_v7  ;;  %v378_v41 = vshrl.u32 (!%p157_p3), %v377_v40, 7 }
   0x9   : > { %571 = vmatprep.subr.msk.bf16.mxu0 (!%p157_p3), %vm268_vm0, %v599_v1  ;;  %572 = vmatprep.subr.msk.bf16.mxu1 (!%p157_p3), %vm268_vm0, %v599_v1 }
   0xa   : > { %v379_v42 = vsub.s32 (!%p157_p3), 0, %v378_v41 }
   0xc   : > { %558 = vmatpush3.bf16.msra.mxu0 (!%p157_p3), %v270_v2  ;;  %570 = vmatpush3.bf16.msra.mxu1 (!%p157_p3), %v270_v2 }
   0xe   : > { %s714_s12 = smov (!%p185_p4, %s620_s12), 1 }
   0xf   : > { %s547_s20 = sshll.u32 %s714_s12, 5  ;;  %v347_v37 = vld [vmem:[#allocation2] sm:$0x1]  ;;  %s548_s26 = sshll.u32 %s714_s12, 6 }
  0x10   : > { %s192_s23 = scalar_lea.vmem %s705_s0, %s547_s20  ;;  %s198_s29 = scalar_lea.vmem %s708_s3, %s548_s26 }
  0x11   : > { %v600_v3 = vld [vmem:[%s192_s23] sm:$0xff]   ;;  %v601_v4 = vld [vmem:[%s192_s23 + $0x8] sm:$0xff]   ;;  %v602_v5 = vld [vmem:[%s192_s23 + $0x10] sm:$0xff]  }
  0x12   : > { %559 = vmatprep.mubr.msk.bf16.mxu0 %vm255_vm1, %v600_v3  ;;  %v603_v6 = vld [vmem:[%s192_s23 + $0x18] sm:$0xff]   ;;  %563 = vmatprep.mubr.msk.bf16.mxu1 %vm255_vm1, %v602_v5 }
  0x13   : > { %560 = vmatmul.mubr.msk.bf16.vlgmr.msra.gmra.mrb[0].mxu0 %vm255_vm1, %v601_v4  ;;  %564 = vmatmul.mubr.msk.bf16.vlgmr.msra.gmra.mrb[0].mxu1 %vm255_vm1, %v603_v6 }
  0xe6   : > { %v561_v8 = vpop.f32.mrb[0].mxu0  ;;  %v565_v12 = vpop.f32.mrb[0].mxu1 }
  0xe7   : > { %v306_v10 = vpop.f32.mrb[1].mxu0  ;;  %v322_v14 = vpop.f32.mrb[1].mxu1  ;;  %v315_v19 = vadd.f32 %v561_v8, %v534_v9  ;;  %v331_v27 = vadd.f32 %v565_v12, %v534_v9 }
  0xe8   : > { %v562_v11 = vpop.f32.mrb[2].mxu0  ;;  %v307_v15 = vadd.f32 %v534_v9, %v306_v10  ;;  %v566_v17 = vpop.f32.mrb[2].mxu1  ;;  %v323_v23 = vadd.f32 %v534_v9, %v322_v14 }
  0xe9   : > { %v309_v13 = vpop.f32.mrb[3].mxu0  ;;  %v325_v18 = vpop.f32.mrb[3].mxu1  ;;  %v318_v21 = vadd.f32 %v562_v11, %v534_v9  ;;  %v334_v29 = vadd.f32 %v566_v17, %v534_v9 }
  0xea   : > { %v310_v16 = vadd.f32 %v534_v9, %v309_v13  ;;  %v326_v26 = vadd.f32 %v534_v9, %v325_v18 }
  0xec   : > { %v348_v20 = vadd.f32 %v310_v16, %v307_v15 }
  0xee   : > { %v349_v22 = vadd.f32 %v348_v20, %v315_v19 }
  0xf0   : > { %v350_v24 = vadd.f32 %v349_v22, %v318_v21 }
  0xf2   : > { %v351_v25 = vadd.f32 %v350_v24, %v323_v23 }
  0xf4   : > { %v352_v28 = vadd.f32 %v351_v25, %v326_v26 }
  0xf6   : > { %v353_v30 = vadd.f32 %v352_v28, %v331_v27 }
  0xf8   : > { %v354_v31 = vadd.f32 %v353_v30, %v334_v29 }
  0xfa   : > { %v355_v32 = vrot.slane %v354_v31, 4 }
  0xfc   : > { %v356_v33 = vadd.f32 %v355_v32, %v354_v31 }
  0xfe   : > { %v357_v34 = vrot.slane %v356_v33, 2 }
 0x100   : > { %v358_v35 = vadd.f32 %v357_v34, %v356_v33 }
 0x102   : > { %v359_v36 = vrot.slane %v358_v35, 1 }
 0x104   : > { %v360_v38 = vadd.f32 %v359_v36, %v358_v35 }
 0x106   : > { %v361_v39 = vadd.f32 %v360_v38, %v347_v37 }
 0x108   : > { %362 = vst [vmem:[#allocation2] sm:$0x1] %v361_v39 }
 0x10f   : > { %v374_v43 = vld [vmem:[#allocation2] sm:$0x1] }
 0x110   : > { %v375_v44 = vmul.f32 0.015625, %v374_v43 }
 0x112   : > { %v380_v45 = vrot.slane %v375_v44, %v379_v42 }
 0x114   : > { %v382_v46 = vsub.f32 %v307_v15, %v380_v45  ;;  %v383_v47 = vsub.f32 %v310_v16, %v380_v45  ;;  %v384_v48 = vsub.f32 %v315_v19, %v380_v45  ;;  %v385_v49 = vsub.f32 %v318_v21, %v380_v45 }
 0x115   : > { %v386_v52 = vsub.f32 %v323_v23, %v380_v45  ;;  %v387_v55 = vsub.f32 %v326_v26, %v380_v45  ;;  %v388_v58 = vsub.f32 %v331_v27, %v380_v45  ;;  %v389_v61 = vsub.f32 %v334_v29, %v380_v45 }
 0x116   : > { %v390_v50 = vmul.f32 %v382_v46, %v382_v46  ;;  %v391_v51 = vmul.f32 %v383_v47, %v383_v47  ;;  %v392_v53 = vmul.f32 %v384_v48, %v384_v48  ;;  %v393_v56 = vmul.f32 %v385_v49, %v385_v49 }
 0x117   : > { %v394_v59 = vmul.f32 %v386_v52, %v386_v52  ;;  %v395_v62 = vmul.f32 %v387_v55, %v387_v55  ;;  %v396_v0 = vmul.f32 %v388_v58, %v388_v58  ;;  %v397_v2 = vmul.f32 %v389_v61, %v389_v61 }
 0x118   : > { %v398_v54 = vadd.f32 %v391_v51, %v390_v50 }
 0x11a   : > { %v399_v57 = vadd.f32 %v398_v54, %v392_v53 }
 0x11c   : > { %v400_v60 = vadd.f32 %v399_v57, %v393_v56 }
 0x11e   : > { %v401_v63 = vadd.f32 %v400_v60, %v394_v59 }
 0x120   : > { %v402_v1 = vadd.f32 %v401_v63, %v395_v62 }
 0x122   : > { %v403_v3 = vadd.f32 %v402_v1, %v396_v0 }
 0x124   : > { %v404_v4 = vadd.f32 %v403_v3, %v397_v2 }
 0x126   : > { %v405_v5 = vrot.slane %v404_v4, 4 }
 0x128   : > { %v406_v6 = vadd.f32 %v405_v5, %v404_v4 }
 0x12a   : > { %v407_v7 = vrot.slane %v406_v6, 2 }
 0x12c   : > { %v408_v8 = vadd.f32 %v407_v7, %v406_v6 }
 0x12e   : > { %v409_v9 = vrot.slane %v408_v8, 1 }
 0x130   : > { %v410_v10 = vadd.f32 %v409_v9, %v408_v8 }
 0x132   : > { %v411_v11 = vmul.f32 0.015625, %v410_v10 }
 0x134   : > { %v412_v12 = vadd.f32 1e-05, %v411_v11 }
 0x136   : > { %604 = vrsqrt.f32 %v412_v12 }
 0x140   : > { %v605_v13 = vpop.eup %604 }
 0x141   : > { %v414_v14 = vmul.f32 %v605_v13, %v382_v46  ;;  %v415_v15 = vmul.f32 %v605_v13, %v383_v47  ;;  %v416_v16 = vmul.f32 %v605_v13, %v384_v48  ;;  %v417_v17 = vmul.f32 %v605_v13, %v385_v49 }
 0x142   : > { %v418_v18 = vmul.f32 %v605_v13, %v386_v52  ;;  %v419_v19 = vmul.f32 %v605_v13, %v387_v55  ;;  %v420_v20 = vmul.f32 %v605_v13, %v388_v58  ;;  %v421_v21 = vmul.f32 %v605_v13, %v389_v61 }
 0x143   : > { %vm422_vm2 = vcmp.ge.f32.partialorder %v414_v14, 0.0  ;;  %vm423_vm3 = vcmp.ge.f32.partialorder %v415_v15, 0.0  ;;  %vm424_vm4 = vcmp.ge.f32.partialorder %v416_v16, 0.0  ;;  %vm425_vm5 = vcmp.ge.f32.partialorder %v417_v17, 0.0 }
 0x144   : > { %vm426_vm6 = vcmp.ge.f32.partialorder %v418_v18, 0.0  ;;  %vm427_vm7 = vcmp.ge.f32.partialorder %v419_v19, 0.0  ;;  %vm428_vm8 = vcmp.ge.f32.partialorder %v420_v20, 0.0  ;;  %vm429_vm9 = vcmp.ge.f32.partialorder %v421_v21, 0.0 }
 0x145   : > { %v430_v22 = vmul.f32 0.2, %v414_v14  ;;  %v431_v23 = vmul.f32 0.2, %v415_v15  ;;  %v432_v24 = vmul.f32 0.2, %v416_v16 }
 0x146   : > { %v433_v25 = vmul.f32 0.2, %v417_v17  ;;  %v434_v26 = vmul.f32 0.2, %v418_v18  ;;  %v435_v27 = vmul.f32 0.2, %v419_v19 }
 0x147   : > { %v436_v28 = vmul.f32 0.2, %v420_v20  ;;  %v437_v29 = vmul.f32 0.2, %v421_v21  ;;  %v438_v30 = vsel %vm422_vm2, %v414_v14, %v430_v22  ;;  %v439_v31 = vsel %vm423_vm3, %v415_v15, %v431_v23 }
 0x148   : > { %v440_v32 = vsel %vm424_vm4, %v416_v16, %v432_v24  ;;  %v441_v33 = vsel %vm425_vm5, %v417_v17, %v433_v25  ;;  %v442_v34 = vsel %vm426_vm6, %v418_v18, %v434_v26  ;;  %v443_v35 = vsel %vm427_vm7, %v419_v19, %v435_v27  ;;  %446 = vst [vmem:[%s198_s29] sm:$0xff] %v438_v30 }
 0x149   : > { %447 = vst [vmem:[%s198_s29 + $0x8] sm:$0xff] %v439_v31  ;;  %v444_v36 = vsel %vm428_vm8, %v420_v20, %v436_v28  ;;  %v445_v37 = vsel %vm429_vm9, %v421_v21, %v437_v29  ;;  %448 = vst [vmem:[%s198_s29 + $0x10] sm:$0xff] %v440_v32 }
 0x14a   : > { %449 = vst [vmem:[%s198_s29 + $0x18] sm:$0xff] %v441_v33  ;;  %450 = vst [vmem:[%s198_s29 + $0x20] sm:$0xff] %v442_v34 }
 0x14b   : > { %451 = vst [vmem:[%s198_s29 + $0x28] sm:$0xff] %v443_v35  ;;  %452 = vst [vmem:[%s198_s29 + $0x30] sm:$0xff] %v444_v36 }
 0x14c   : > { %453 = vst [vmem:[%s198_s29 + $0x38] sm:$0xff] %v445_v37 }
 0x14d PF: > { %s13_s14 = sadd.s32 1, %s628_s14   ;;  %s709_s12 = smov %s624_s13 }
 0x14e   : > { %p10_p5 = scmp.ge.s32.totalorder %s13_s14, 4   ;;  %s710_s13 = smov %s712_s15 }
 0x150   :  { %12 = sbr.rel (!%p10_p5) target bundleno = 2 (0x2), region = 71 }

</bundles_post_ra>
